<compile_context>
chip_gen: v6e
topology: v6e:2x2x1
jax: 0.10.0
libtpu: 0.0.40
codegen_flags: <defaults>
</compile_context>

<pallas_src>
import functools

import jax
import jax.numpy as jnp
from jax.experimental import pallas as pl
from jax.experimental.pallas import tpu as pltpu


_LANE = 128
_TM_MAX = 2048   # v5e/v6e have 128 MiB VMEM; the waste-limit heuristic shrinks this


def _round_up(x, m):
    return ((x + m - 1) // m) * m


def _cdiv(a, b):
    return (a + b - 1) // b


def _vmem_limit_bytes():
    """Scoped-VMEM limit sized from hardware (~48 MiB on v7x, up to 96 MiB on v5e/v6e)."""
    try:
        cap = int(pltpu.get_tpu_info().vmem_capacity_bytes)
    except Exception:
        cap = 64 * 1024 * 1024
    return max(16 * 1024 * 1024, min((cap * 3) // 4, 96 * 1024 * 1024))


def _pick_tile_rows(phase_ms, kcp, cout, cop, vmem_limit):
    """Common M-tile for all phases.

    Budget accounts for double-buffered bf16 patches, bf16 conv-out, the
    (phase-indexed) weight block and the stats block.  Among power-of-two
    candidates that fit, take the largest whose total tail padding across
    phases stays under ~12.5% (balanced tiles, avoids the old
    round-up-to-TM_MAX tail blowup, keeps >=2 grid tiles for v7x megacore).
    """
    budget = (vmem_limit * 3) // 5
    fixed = 2 * (kcp * cop * 2) + 2 * (2 * cop * 4)      # weight + stats blocks (dbl-buffered)
    per_row = 2 * (kcp * 2) + 2 * (cout * 2)             # patches + conv out (dbl-buffered, bf16)
    if budget > fixed:
        cap = max(8, min(_TM_MAX, ((budget - fixed) // per_row) // 8 * 8))
    else:
        cap = 8
    total = sum(phase_ms)
    best = 8
    tm = 8
    while tm <= cap:
        padded = sum(_cdiv(m, tm) * tm for m in phase_ms)
        if padded * 8 <= total * 9:                      # <= 12.5% padding waste
            best = tm
        tm *= 2
    return best


# --------------------------- Pallas kernels ---------------------------------


def _conv_stats_kernel(phase_ref, valid_ref, patches_ref, w_ref, conv_ref, stats_ref, *, tm):
    """One M-tile of one phase: conv-as-matmul (bf16 operands, f32 MXU acc),
    bf16 Cout-wide store of the conv result, masked f32 BN partial sums.

    phase_ref/valid_ref are SMEM scalar-prefetch arrays (tile -> weight-phase,
    tile -> number of valid rows).  No bias add: the bias cancels under
    training-mode BN and is folded out in the wrapper.
    """
    del phase_ref  # only used by the weight BlockSpec index_map
    i = pl.program_id(0)
    acc = jnp.dot(patches_ref[...], w_ref[0], preferred_element_type=jnp.float32)

    # BN partial sums over this tile's valid rows only (tail tiles are padded).
    nvalid = valid_ref[i]
    row = jax.lax.broadcasted_iota(jnp.int32, (tm, 1), 0)
    mask = (row < nvalid).astype(jnp.float32)
    am = acc * mask
    stats_ref[:, 0:1, :] = jnp.sum(am, axis=0, keepdims=True).reshape(1, 1, -1)
    stats_ref[:, 1:2, :] = jnp.sum(am * acc, axis=0, keepdims=True).reshape(1, 1, -1)

    # Conv intermediate: bf16 and only the real Cout channels (not COP-padded).
    cout = conv_ref.shape[1]
    conv_ref[...] = acc[:, :cout].astype(conv_ref.dtype)


def _bn_relu_kernel(conv_ref, ss_ref, o_ref):
    """y = relu(conv * scale + shift); conv read as bf16, upcast in-register."""
    scale = ss_ref[0:1, :]
    shift = ss_ref[1:2, :]
    c = conv_ref[...].astype(jnp.float32)
    o_ref[...] = jnp.maximum(c * scale + shift, 0.0).astype(o_ref.dtype)


# --------------------------- pallas_call wrappers ----------------------------


def _conv_stats_all_phases(patches_all, w_stack, tile_phase, tile_valid, tm, cout, vmem_limit):
    m_pad_total, kcp = patches_all.shape
    _, _, cop = w_stack.shape
    num_tiles = m_pad_total // tm
    conv_all, stats = pl.pallas_call(
        functools.partial(_conv_stats_kernel, tm=tm),
        out_shape=(jax.ShapeDtypeStruct((m_pad_total, cout), jnp.bfloat16),
                   jax.ShapeDtypeStruct((num_tiles, 2, cop), jnp.float32)),
        grid_spec=pltpu.PrefetchScalarGridSpec(
            num_scalar_prefetch=2,
            grid=(num_tiles,),
            in_specs=[
                pl.BlockSpec((tm, kcp), lambda i, ph, tv: (i, 0)),
                # Tiles are grouped by phase, so the weight block only re-DMAs
                # at phase boundaries.
                pl.BlockSpec((1, kcp, cop), lambda i, ph, tv: (ph[i], 0, 0)),
            ],
            out_specs=(
                pl.BlockSpec((tm, cout), lambda i, ph, tv: (i, 0)),
                pl.BlockSpec((1, 2, cop), lambda i, ph, tv: (i, 0, 0)),
            ),
        ),
        compiler_params=pltpu.CompilerParams(
            dimension_semantics=("parallel",),
            vmem_limit_bytes=vmem_limit),
    )(tile_phase, tile_valid, patches_all, w_stack)
    return conv_all, stats


def _bn_relu_all(conv_all, ss, tm, vmem_limit):
    m_pad_total, cout = conv_all.shape
    num_tiles = m_pad_total // tm
    return pl.pallas_call(
        _bn_relu_kernel,
        out_shape=jax.ShapeDtypeStruct((m_pad_total, cout), jnp.float32),
        grid_spec=pl.GridSpec(
            grid=(num_tiles,),
            in_specs=[
                pl.BlockSpec((tm, cout), lambda i: (i, 0)),
                pl.BlockSpec((2, cout), lambda i: (0, 0)),
            ],
            out_specs=pl.BlockSpec((tm, cout), lambda i: (i, 0)),
        ),
        compiler_params=pltpu.CompilerParams(
            dimension_semantics=("parallel",),
            vmem_limit_bytes=vmem_limit),
    )(conv_all, ss)


# ----------------------------- glue / wrapper --------------------------------


def _phase_meta(size, s, p, op, dil, K):
    """Per-dim phase decomposition of the transposed conv.

    Output position o = i*s - p + k*dil.  For phase r = o % s the valid taps
    are k with (r + p - k*dil) % s == 0 and the needed input index for output
    j (o = r + s*j) is i = j + off_k with off_k = (r + p - k*dil) // s.
    Returns (out_size, [(n_r, [(k, off_k), ...])], pad_lo, pad_hi).
    """
    out = (size - 1) * s - 2 * p + dil * (K - 1) + op + 1
    per_phase = []
    for r in range(s):
        n = len(range(r, out, s)) if out > 0 else 0
        taps = [(k, (r + p - k * dil) // s) for k in range(K)
                if (r + p - k * dil) % s == 0]
        if not taps:
            taps = [(-1, 0)]   # no contributing tap for this phase -> zero weight
        per_phase.append((n, taps))
    lo, hi = 0, 0
    for n, taps in per_phase:
        if n == 0:
            continue
        for _, off in taps:
            lo = max(lo, -off)
            hi = max(hi, off + n - 1 - (size - 1))
    return out, per_phase, lo, hi


def deconv_block_forward(x, weight, bias, gamma, beta, *,
                         stride, padding, output_padding, dilation, eps=1e-5):
    """x: (N,Cin,D,H,W); weight: (Cin,Cout,Kd,Kh,Kw) -> (N,Cout,Do,Ho,Wo)."""
    N, Cin, D, H, W = x.shape
    _, Cout, Kd, Kh, Kw = weight.shape
    sd, sh, sw = stride
    pd, ph, pw = padding
    opd, oph, opw = output_padding
    dd, dh, dw = dilation

    Do, phases_d, lod, hid = _phase_meta(D, sd, pd, opd, dd, Kd)
    Ho, phases_h, loh, hih = _phase_meta(H, sh, ph, oph, dh, Kh)
    Wo, phases_w, low, hiw = _phase_meta(W, sw, pw, opw, dw, Kw)

    # Pad matmul N-width for the MXU (256-wide on v6e/v7x when Cout needs it).
    COP = _round_up(Cout, 256) if Cout > _LANE else _LANE
    vmem_limit = _vmem_limit_bytes()

    # channels-last, cast to bf16 BEFORE the halo pad (halves the pad bytes);
    # every (phase, tap) window then is a plain static slice.
    x_cl = jnp.transpose(x, (0, 2, 3, 4, 1)).astype(jnp.bfloat16)
    x_pad = jnp.pad(x_cl, ((0, 0), (lod, hid), (loh, hih), (low, hiw), (0, 0)))

    w_f32 = weight.astype(jnp.float32)
    zero_tap = jnp.zeros((Cin, Cout), jnp.float32)

    # ---- enumerate phases, gather valid-tap windows + per-phase weights -----
    # TODO(synk): eliminate this HBM im2col via memory_space=pl.ANY + in-kernel
    # halo-window DMA and VMEM tap accumulation.
    phases = []
    for rd, (nd, taps_d) in enumerate(phases_d):
        for rh, (nh, taps_h) in enumerate(phases_h):
            for rw, (nw, taps_w) in enumerate(phases_w):
                if nd == 0 or nh == 0 or nw == 0:
                    continue
                wins, wtaps = [], []
                for kd, od in taps_d:
                    for kh, oh in taps_h:
                        for kw, ow in taps_w:
                            wins.append(x_pad[:, od + lod:od + lod + nd,
                                              oh + loh:oh + loh + nh,
                                              ow + low:ow + low + nw, :])
                            wtaps.append(zero_tap if (kd < 0 or kh < 0 or kw < 0)
                                         else w_f32[:, :, kd, kh, kw])
                phases.append(dict(rd=rd, rh=rh, rw=rw, nd=nd, nh=nh, nw=nw,
                                   wins=wins, wtaps=wtaps,
                                   m=N * nd * nh * nw, kc=len(wins) * Cin))

    kcp = _round_up(max(p_["kc"] for p_ in phases), _LANE)
    tm = _pick_tile_rows([p_["m"] for p_ in phases], kcp, Cout, COP, vmem_limit)

    patch_segs, w_mats, tile_phase, tile_valid, seg_off = [], [], [], [], []
    off = 0
    for pidx, ph_ in enumerate(phases):
        m = ph_["m"]
        m_pad = _round_up(m, tm)
        nt = m_pad // tm
        patches = jnp.stack(ph_["wins"], axis=4).reshape(m, ph_["kc"])
        patches = jnp.pad(patches, ((0, m_pad - m), (0, kcp - ph_["kc"])))
        patch_segs.append(patches)
        w_mat = jnp.stack(ph_["wtaps"], axis=0).reshape(ph_["kc"], Cout)
        w_mat = jnp.pad(w_mat, ((0, kcp - ph_["kc"]), (0, COP - Cout)))
        w_mats.append(w_mat.astype(jnp.bfloat16))
        tile_phase += [pidx] * nt
        tile_valid += [tm] * (nt - 1) + [m - (nt - 1) * tm]
        seg_off.append(off)
        off += m_pad

    patches_all = jnp.concatenate(patch_segs, axis=0)          # (sum_m_pad, kcp) bf16
    w_stack = jnp.stack(w_mats, axis=0)                        # (n_phases, kcp, COP) bf16
    tile_phase = jnp.asarray(tile_phase, jnp.int32)
    tile_valid = jnp.asarray(tile_valid, jnp.int32)

    # ---- pass 1: single launch across all phases ----------------------------
    conv_all, stats = _conv_stats_all_phases(
        patches_all, w_stack, tile_phase, tile_valid, tm, Cout, vmem_limit)

    # ---- BN (training-mode batch stats) folded into one scale/shift ---------
    # The ConvTranspose bias cancels exactly under batch-stat BN (variance is
    # bias-invariant and the mean subtraction removes it), so it never enters
    # the kernels.  Stats are accumulated bias-free (better conditioned).
    del bias
    m_total = float(N * Do * Ho * Wo)
    stats_sum = jnp.sum(stats, axis=0)[:, :Cout]               # (2, Cout) f32
    mean = stats_sum[0] / m_total
    var = jnp.maximum(stats_sum[1] / m_total - mean * mean, 0.0)
    scale = gamma.astype(jnp.float32) * jax.lax.rsqrt(var + eps)
    shift = beta.astype(jnp.float32) - mean * scale
    ss = jnp.stack([scale, shift], axis=0)                     # (2, Cout)

    # ---- pass 2: single launch, relu(conv*scale + shift), Cout-wide ---------
    y_all = _bn_relu_all(conv_all, ss, tm, vmem_limit)

    # ---- scatter phases into (N,Do,Ho,Wo,Cout), then back to NCDHW ----------
    out_cl = jnp.zeros((N, Do, Ho, Wo, Cout), jnp.float32)
    for ph_, o0 in zip(phases, seg_off):
        y = y_all[o0:o0 + ph_["m"]].reshape(N, ph_["nd"], ph_["nh"], ph_["nw"], Cout)
        out_cl = out_cl.at[:, ph_["rd"]::sd, ph_["rh"]::sh, ph_["rw"]::sw, :].set(y)
    return jnp.transpose(out_cl, (0, 4, 1, 2, 3))


# ----------------------------- pure-JAX reference ----------------------------


def _reference(x, weight, bias, gamma, beta, stride, padding, output_padding, dilation, eps):
    Ks = weight.shape[2:]
    rhs = jnp.flip(weight, axis=(2, 3, 4))
    rhs = jnp.transpose(rhs, (1, 0, 2, 3, 4))        # (Cout, Cin, Kd, Kh, Kw)
    pads = tuple((dil * (K - 1) - p, dil * (K - 1) - p + op)
                 for dil, K, p, op in zip(dilation, Ks, padding, output_padding))
    y = jax.lax.conv_general_dilated(
        x, rhs, window_strides=(1, 1, 1), padding=pads,
        lhs_dilation=stride, rhs_dilation=dilation,
        dimension_numbers=("NCDHW", "OIDHW", "NCDHW"))
    y = y + bias.reshape(1, -1, 1, 1, 1)
    mean = jnp.mean(y, axis=(0, 2, 3, 4), keepdims=True)
    var = jnp.mean((y - mean) ** 2, axis=(0, 2, 3, 4), keepdims=True)
    y = (y - mean) * jax.lax.rsqrt(var + eps) * gamma.reshape(1, -1, 1, 1, 1) \
        + beta.reshape(1, -1, 1, 1, 1)
    return jnp.maximum(y, 0.0)


if __name__ == "__main__":
    # DeconvBlock(in_channels=4, out_channels=8, kernel_size=3, stride=2)
    # (module hardcodes padding=[0,1,1], output_padding=[0,1,1]; conv bias=True)
    N, Cin, Cout = 2, 4, 8
    D, H, W = 4, 8, 8
    K = 3
    stride = (2, 2, 2)
    padding = (0, 1, 1)
    output_padding = (0, 1, 1)
    dilation = (1, 1, 1)

    key = jax.random.PRNGKey(0)
    kx, kw, kb = jax.random.split(key, 3)
    x = jax.random.normal(kx, (N, Cin, D, H, W), dtype=jnp.float32)
    weight = 0.1 * jax.random.normal(kw, (Cin, Cout, K, K, K), dtype=jnp.float32)
    bias = 0.1 * jax.random.normal(kb, (Cout,), dtype=jnp.float32)
    gamma = jnp.ones((Cout,), jnp.float32)   # BatchNorm3d weight init
    beta = jnp.zeros((Cout,), jnp.float32)   # BatchNorm3d bias init

    fwd = jax.jit(functools.partial(
        deconv_block_forward, stride=stride, padding=padding,
        output_padding=output_padding, dilation=dilation))
    y = jax.block_until_ready(fwd(x, weight, bias, gamma, beta))

    y_ref = jax.block_until_ready(_reference(
        x, weight, bias, gamma, beta, stride, padding, output_padding, dilation, 1e-5))

    expected_shape = (N, Cout, 9, 16, 16)
    assert y.shape == expected_shape, (y.shape, expected_shape)
    assert y_ref.shape == expected_shape, (y_ref.shape, expected_shape)
    assert bool(jnp.all(jnp.isfinite(y))) and bool(jnp.all(y >= 0.0))
    max_err = float(jnp.max(jnp.abs(y - y_ref)))
    assert max_err < 5e-2, f"mismatch vs reference: max abs err {max_err}"
    print("KERNEL_OK")
</pallas_src>

<mosaic_0001>
module attributes {stable_mosaic.version = 11 : i64} {
  func.func @_conv_stats_kernel(%arg0: i32, %arg1: memref<20xi32, #tpu.memory_space<smem>>, %arg2: memref<20xi32, #tpu.memory_space<smem>>, %arg3: memref<256x128xbf16, #tpu.memory_space<vmem>>, %arg4: memref<1x128x128xbf16, #tpu.memory_space<vmem>>, %arg5: memref<256x8xbf16, #tpu.memory_space<vmem>>, %arg6: memref<1x2x128xf32, #tpu.memory_space<vmem>>) attributes {dimension_semantics = [#tpu.dimension_semantics<parallel>], iteration_bounds = array<i64: 20>, scalar_prefetch = 2 : i64, scratch_operands = 0 : i64, tpu.core_type = #tpu.core_type<tc>, window_params = [{transform_indices = @transform_0, window_bounds = array<i64: 256, 128>}, {transform_indices = @transform_1, window_bounds = array<i64: 1, 128, 128>}, {transform_indices = @transform_2, window_bounds = array<i64: 256, 8>}, {transform_indices = @transform_3, window_bounds = array<i64: 1, 2, 128>}]} {
    %c0 = arith.constant 0 : index
    %c0_0 = arith.constant 0 : index
    %0 = vector.load %arg3[%c0, %c0_0] : memref<256x128xbf16, #tpu.memory_space<vmem>>, vector<256x128xbf16>
    %c0_1 = arith.constant 0 : index
    %c0_2 = arith.constant 0 : index
    %c0_3 = arith.constant 0 : index
    %1 = vector.load %arg4[%c0_1, %c0_2, %c0_3] : memref<1x128x128xbf16, #tpu.memory_space<vmem>>, vector<1x128x128xbf16>
    %2 = vector.shape_cast %1 : vector<1x128x128xbf16> to vector<128x128xbf16>
    %cst = arith.constant dense<0.000000e+00> : vector<256x128xf32>
    %3 = tpu.matmul %0, %2, %cst {dimension_numbers = #tpu.dot_dimension_numbers<[1], [0], [0], [1], [0, 0, 1, 1], [], []>} : vector<256x128xbf16>, vector<128x128xbf16>, vector<256x128xf32> -> vector<256x128xf32>
    %4 = arith.index_cast %arg0 : i32 to index
    %5 = memref.load %arg2[%4] : memref<20xi32, #tpu.memory_space<smem>>
    %6 = tpu.iota {dimensions = array<i32: 0>} : vector<256x1xi32>
    %7 = vector.broadcast %5 : i32 to vector<256x1xi32>
    %8 = arith.cmpi slt, %6, %7 : vector<256x1xi32>
    %9 = arith.extui %8 : vector<256x1xi1> to vector<256x1xi32>
    %10 = arith.sitofp %9 : vector<256x1xi32> to vector<256x1xf32>
    %11 = vector.broadcast %10 : vector<256x1xf32> to vector<256x128xf32>
    %12 = arith.mulf %3, %11 : vector<256x128xf32>
    %cst_4 = arith.constant dense<0.000000e+00> : vector<128xf32>
    %13 = vector.multi_reduction <add>, %12, %cst_4 [0] : vector<256x128xf32> to vector<128xf32>
    %14 = vector.shape_cast %13 : vector<128xf32> to vector<1x128xf32>
    %15 = vector.shape_cast %14 : vector<1x128xf32> to vector<1x1x128xf32>
    %c0_5 = arith.constant 0 : index
    %c0_6 = arith.constant 0 : index
    %c0_7 = arith.constant 0 : index
    %16 = vector.load %arg6[%c0_5, %c0_6, %c0_7] : memref<1x2x128xf32, #tpu.memory_space<vmem>>, vector<1x1x128xf32>
    tpu.vector_store %arg6[%c0_5, %c0_6, %c0_7], %15 {strides = array<i32>} : memref<1x2x128xf32, #tpu.memory_space<vmem>>, vector<1x1x128xf32>,
    %17 = arith.mulf %12, %3 : vector<256x128xf32>
    %cst_8 = arith.constant dense<0.000000e+00> : vector<128xf32>
    %18 = vector.multi_reduction <add>, %17, %cst_8 [0] : vector<256x128xf32> to vector<128xf32>
    %19 = vector.shape_cast %18 : vector<128xf32> to vector<1x128xf32>
    %20 = vector.shape_cast %19 : vector<1x128xf32> to vector<1x1x128xf32>
    %c0_9 = arith.constant 0 : index
    %c1 = arith.constant 1 : index
    %c0_10 = arith.constant 0 : index
    %21 = vector.load %arg6[%c0_9, %c1, %c0_10] : memref<1x2x128xf32, #tpu.memory_space<vmem>>, vector<1x1x128xf32>
    tpu.vector_store %arg6[%c0_9, %c1, %c0_10], %20 {strides = array<i32>} : memref<1x2x128xf32, #tpu.memory_space<vmem>>, vector<1x1x128xf32>,
    %22 = vector.extract_strided_slice %3 {offsets = [0, 0], sizes = [256, 8], strides = [1, 1]} : vector<256x128xf32> to vector<256x8xf32>
    %23 = arith.truncf %22 : vector<256x8xf32> to vector<256x8xbf16>
    %c0_11 = arith.constant 0 : index
    %c0_12 = arith.constant 0 : index
    %24 = vector.load %arg5[%c0_11, %c0_12] : memref<256x8xbf16, #tpu.memory_space<vmem>>, vector<256x8xbf16>
    tpu.vector_store %arg5[%c0_11, %c0_12], %23 {strides = array<i32>} : memref<256x8xbf16, #tpu.memory_space<vmem>>, vector<256x8xbf16>,
    return
  }
  func.func @transform_0(%arg0: i32, %arg1: memref<20xi32, #tpu.memory_space<smem>>, %arg2: memref<20xi32, #tpu.memory_space<smem>>) -> (i32, i32) {
    %c0_i32 = arith.constant 0 : i32
    %c0_i32_0 = arith.constant 0 : i32
    return %arg0, %c0_i32 : i32, i32
  }
  func.func @transform_1(%arg0: i32, %arg1: memref<20xi32, #tpu.memory_space<smem>>, %arg2: memref<20xi32, #tpu.memory_space<smem>>) -> (i32, i32, i32) {
    %0 = arith.index_cast %arg0 : i32 to index
    %1 = memref.load %arg1[%0] : memref<20xi32, #tpu.memory_space<smem>>
    %c0_i32 = arith.constant 0 : i32
    %c0_i32_0 = arith.constant 0 : i32
    %c0_i32_1 = arith.constant 0 : i32
    return %1, %c0_i32, %c0_i32_0 : i32, i32, i32
  }
  func.func @transform_2(%arg0: i32, %arg1: memref<20xi32, #tpu.memory_space<smem>>, %arg2: memref<20xi32, #tpu.memory_space<smem>>) -> (i32, i32) {
    %c0_i32 = arith.constant 0 : i32
    %c0_i32_0 = arith.constant 0 : i32
    return %arg0, %c0_i32 : i32, i32
  }
  func.func @transform_3(%arg0: i32, %arg1: memref<20xi32, #tpu.memory_space<smem>>, %arg2: memref<20xi32, #tpu.memory_space<smem>>) -> (i32, i32, i32) {
    %c0_i32 = arith.constant 0 : i32
    %c0_i32_0 = arith.constant 0 : i32
    %c0_i32_1 = arith.constant 0 : i32
    return %arg0, %c0_i32, %c0_i32_0 : i32, i32, i32
  }
}

module attributes {stable_mosaic.version = 11 : i64} {
  func.func @_bn_relu_kernel(%arg0: i32, %arg1: memref<256x8xbf16, #tpu.memory_space<vmem>>, %arg2: memref<2x8xf32, #tpu.memory_space<vmem>>, %arg3: memref<256x8xf32, #tpu.memory_space<vmem>>) attributes {dimension_semantics = [#tpu.dimension_semantics<parallel>], iteration_bounds = array<i64: 20>, scalar_prefetch = 0 : i64, scratch_operands = 0 : i64, tpu.core_type = #tpu.core_type<tc>, window_params = [{transform_indices = @transform_0, window_bounds = array<i64: 256, 8>}, {pipeline_mode = #tpu.pipeline_mode<synchronous>, transform_indices = @transform_1, window_bounds = array<i64: 2, 8>}, {transform_indices = @transform_2, window_bounds = array<i64: 256, 8>}]} {
    %c0 = arith.constant 0 : index
    %c0_0 = arith.constant 0 : index
    %0 = vector.load %arg2[%c0, %c0_0] : memref<2x8xf32, #tpu.memory_space<vmem>>, vector<1x8xf32>
    %c1 = arith.constant 1 : index
    %c0_1 = arith.constant 0 : index
    %1 = vector.load %arg2[%c1, %c0_1] : memref<2x8xf32, #tpu.memory_space<vmem>>, vector<1x8xf32>
    %c0_2 = arith.constant 0 : index
    %c0_3 = arith.constant 0 : index
    %2 = vector.load %arg1[%c0_2, %c0_3] : memref<256x8xbf16, #tpu.memory_space<vmem>>, vector<256x8xbf16>
    %3 = arith.extf %2 : vector<256x8xbf16> to vector<256x8xf32>
    %4 = vector.broadcast %0 : vector<1x8xf32> to vector<256x8xf32>
    %5 = arith.mulf %3, %4 : vector<256x8xf32>
    %6 = vector.broadcast %1 : vector<1x8xf32> to vector<256x8xf32>
    %7 = arith.addf %5, %6 : vector<256x8xf32>
    %cst = arith.constant 0.000000e+00 : f32
    %8 = vector.broadcast %cst : f32 to vector<256x8xf32>
    %9 = arith.maximumf %7, %8 : vector<256x8xf32>
    %c0_4 = arith.constant 0 : index
    %c0_5 = arith.constant 0 : index
    %10 = vector.load %arg3[%c0_4, %c0_5] : memref<256x8xf32, #tpu.memory_space<vmem>>, vector<256x8xf32>
    tpu.vector_store %arg3[%c0_4, %c0_5], %9 {strides = array<i32>} : memref<256x8xf32, #tpu.memory_space<vmem>>, vector<256x8xf32>,
    return
  }
  func.func @transform_0(%arg0: i32) -> (i32, i32) {
    %c0_i32 = arith.constant 0 : i32
    %c0_i32_0 = arith.constant 0 : i32
    return %arg0, %c0_i32 : i32, i32
  }
  func.func @transform_1(%arg0: i32) -> (i32, i32) {
    %c0_i32 = arith.constant 0 : i32
    %c0_i32_0 = arith.constant 0 : i32
    %c0_i32_1 = arith.constant 0 : i32
    return %c0_i32, %c0_i32_0 : i32, i32
  }
  func.func @transform_2(%arg0: i32) -> (i32, i32) {
    %c0_i32 = arith.constant 0 : i32
    %c0_i32_0 = arith.constant 0 : i32
    return %arg0, %c0_i32 : i32, i32
  }
}

</mosaic_0001>

<bundles_post_ra>
// kernel: deconv_block_forward.3
= control target key start
LH: loop header
LB: loop body
LE: loop exit
PB: predicated region body
PF: predicated region fallthrough
CT: control target
= control target key end

     0   :  { %s529_s9 = smov 0   ;;  %s708_s0 = inlined_call_operand.vmem [shape: bf16[5120,8], index: 0, kind: input, shape index: {}]   ;;  %s709_s1 = inlined_call_operand.vmem [shape: f32[2,8], index: 1, kind: input, shape index: {}]   ;;  %s710_s2 = inlined_call_operand.vmem [shape: f32[5120,8], index: 2, kind: output, shape index: {}]  }
   0x1 LB: > { %s406_s10 = sadd.s32 4294967295, %s512_s9   ;;  %p410_p0 = scmp.ge.s32.totalorder %s512_s9, 1  ;;  %s512_s9 = sphi %s529_s9, %s12_s9  }
   0x2   : > { %p113_p1 = scmp.lt.s32.totalorder %s512_s9, 21 }
   0x4   : > { %p114_p2 = pnand %p410_p0, %p113_p1 }
   0x5   : > { %s411_s11 = sshll.u32 (!%p114_p2), %s406_s10, 5 }
   0x6   : > { %117 = sbr.rel (%p114_p2) target bundleno = 51 (0x33), region = 28  ;;  %p136_p3 = scmp.lt.s32.totalorder (!%p114_p2), %s411_s11, 639 }
   0xb   : > { %s712_s11 = smov (!%p136_p3, %s411_s11), 639  ;;  %v548_v0 = vld [vmem:[%s709_s1] ss:$0 sm:$0xff]  ;;  %vm317_vm0 = vcmask 64512   ;;  %v557_v9 = vld [vmem:[%s709_s1 + $0x1] ss:$0 sm:$0xff] }
   0xc   : > { %s412_s12 = sshll.u32 %s712_s11, 2  ;;  %s414_s20 = sshll.u32 %s712_s11, 3 }
   0xd   : > { %s543_s15 = scalar_lea.vmem %s708_s0, %s412_s12  ;;  %s575_s23 = scalar_lea.vmem %s710_s2, %s414_s20 }
   0xe   : > { %v420_v1 = vld [vmem:[%s543_s15] sm:$0xff]   ;;  %v483_v2 = vld [vmem:[%s543_s15 + $0x8] sm:$0xff]   ;;  %v484_v3 = vld [vmem:[%s543_s15 + $0x10] sm:$0xff]  }
   0xf   : > { %v421_v4 = vunpack.c.l.bf16 %v420_v1  ;;  %v422_v5 = vunpack.c.h.bf16 %v420_v1  ;;  %v425_v6 = vunpack.c.l.bf16 %v483_v2  ;;  %v426_v7 = vunpack.c.h.bf16 %v483_v2  ;;  %v485_v8 = vld [vmem:[%s543_s15 + $0x18] sm:$0xff]   ;;  %v486_v30 = vld [vmem:[%s543_s15 + $0x20] sm:$0xff]   ;;  %v487_v31 = vld [vmem:[%s543_s15 + $0x28] sm:$0xff]  }
  0x10   : > { %v429_v10 = vunpack.c.l.bf16 %v484_v3  ;;  %v430_v11 = vunpack.c.h.bf16 %v484_v3  ;;  %v433_v12 = vunpack.c.l.bf16 %v485_v8  ;;  %v434_v13 = vunpack.c.h.bf16 %v485_v8  ;;  %v488_v36 = vld [vmem:[%s543_s15 + $0x30] sm:$0xff]   ;;  %v489_v37 = vld [vmem:[%s543_s15 + $0x38] sm:$0xff]   ;;  %v490_v3 = vld [vmem:[%s543_s15 + $0x40] sm:$0xff]  }
  0x11   : > { %v217_v14 = vmul.f32 %v421_v4, %v548_v0  ;;  %v218_v15 = vmul.f32 %v422_v5, %v548_v0  ;;  %v219_v16 = vmul.f32 %v425_v6, %v548_v0  ;;  %v220_v17 = vmul.f32 %v426_v7, %v548_v0  ;;  %v491_v4 = vld [vmem:[%s543_s15 + $0x48] sm:$0xff]  }
  0x12   : > { %v221_v18 = vmul.f32 %v429_v10, %v548_v0  ;;  %v222_v19 = vmul.f32 %v430_v11, %v548_v0  ;;  %v223_v20 = vmul.f32 %v433_v12, %v548_v0  ;;  %v224_v21 = vmul.f32 %v434_v13, %v548_v0  ;;  %v492_v10 = vld [vmem:[%s543_s15 + $0x50] sm:$0xff]   ;;  %v493_v11 = vld [vmem:[%s543_s15 + $0x58] sm:$0xff]  }
  0x13   : > { %v253_v22 = vadd.f32 %v557_v9, %v217_v14  ;;  %v254_v23 = vadd.f32 %v557_v9, %v218_v15  ;;  %v255_v24 = vadd.f32 %v557_v9, %v219_v16  ;;  %v256_v25 = vadd.f32 %v557_v9, %v220_v17 }
  0x14   : > { %v257_v26 = vadd.f32 %v557_v9, %v221_v18  ;;  %v258_v27 = vadd.f32 %v557_v9, %v222_v19  ;;  %v259_v28 = vadd.f32 %v557_v9, %v223_v20  ;;  %v260_v29 = vadd.f32 %v557_v9, %v224_v21 }
  0x15   : > { %v285_v32 = vmax.f32 %v253_v22, 0.0  ;;  %v286_v33 = vmax.f32 %v254_v23, 0.0  ;;  %v287_v34 = vmax.f32 %v255_v24, 0.0  ;;  %v288_v35 = vmax.f32 %v256_v25, 0.0 }
  0x16   : > { %v289_v38 = vmax.f32 %v257_v26, 0.0  ;;  %v290_v39 = vmax.f32 %v258_v27, 0.0  ;;  %v291_v40 = vmax.f32 %v259_v28, 0.0  ;;  %v292_v41 = vmax.f32 %v260_v29, 0.0 }
  0x17   : > { %318 = vst.msk [vmem:[%s575_s23] sm:$0xff] %vm317_vm0, %v285_v32  ;;  %319 = vst.msk [vmem:[%s575_s23 + $0x8] sm:$0xff] %vm317_vm0, %v286_v33  ;;  %v437_v42 = vunpack.c.l.bf16 %v486_v30  ;;  %v438_v43 = vunpack.c.h.bf16 %v486_v30  ;;  %v441_v44 = vunpack.c.l.bf16 %v487_v31  ;;  %v442_v45 = vunpack.c.h.bf16 %v487_v31 }
  0x18   : > { %320 = vst.msk [vmem:[%s575_s23 + $0x10] sm:$0xff] %vm317_vm0, %v287_v34  ;;  %321 = vst.msk [vmem:[%s575_s23 + $0x18] sm:$0xff] %vm317_vm0, %v288_v35  ;;  %v445_v46 = vunpack.c.l.bf16 %v488_v36  ;;  %v446_v47 = vunpack.c.h.bf16 %v488_v36  ;;  %v449_v48 = vunpack.c.l.bf16 %v489_v37  ;;  %v450_v49 = vunpack.c.h.bf16 %v489_v37 }
  0x19   : > { %322 = vst.msk [vmem:[%s575_s23 + $0x20] sm:$0xff] %vm317_vm0, %v289_v38  ;;  %323 = vst.msk [vmem:[%s575_s23 + $0x28] sm:$0xff] %vm317_vm0, %v290_v39  ;;  %v225_v50 = vmul.f32 %v437_v42, %v548_v0  ;;  %v226_v51 = vmul.f32 %v438_v43, %v548_v0  ;;  %v227_v52 = vmul.f32 %v441_v44, %v548_v0  ;;  %v453_v16 = vunpack.c.l.bf16 %v490_v3 }
  0x1a   : > { %324 = vst.msk [vmem:[%s575_s23 + $0x30] sm:$0xff] %vm317_vm0, %v291_v40  ;;  %325 = vst.msk [vmem:[%s575_s23 + $0x38] sm:$0xff] %vm317_vm0, %v292_v41  ;;  %v228_v53 = vmul.f32 %v442_v45, %v548_v0  ;;  %v229_v54 = vmul.f32 %v445_v46, %v548_v0  ;;  %v230_v55 = vmul.f32 %v446_v47, %v548_v0  ;;  %v454_v17 = vunpack.c.h.bf16 %v490_v3  ;;  %v494_v40 = vld [vmem:[%s543_s15 + $0x60] sm:$0xff]   ;;  %v495_v41 = vld [vmem:[%s543_s15 + $0x68] sm:$0xff]  }
  0x1b   : > { %v231_v56 = vmul.f32 %v449_v48, %v548_v0  ;;  %v232_v57 = vmul.f32 %v450_v49, %v548_v0  ;;  %v261_v58 = vadd.f32 %v557_v9, %v225_v50  ;;  %v262_v59 = vadd.f32 %v557_v9, %v226_v51  ;;  %v496_v46 = vld [vmem:[%s543_s15 + $0x70] sm:$0xff]   ;;  %v497_v47 = vld [vmem:[%s543_s15 + $0x78] sm:$0xff]  }
  0x1c   : > { %v263_v60 = vadd.f32 %v557_v9, %v227_v52  ;;  %v264_v61 = vadd.f32 %v557_v9, %v228_v53  ;;  %v265_v62 = vadd.f32 %v557_v9, %v229_v54  ;;  %v266_v63 = vadd.f32 %v557_v9, %v230_v55 }
  0x1d   : > { %v267_v1 = vadd.f32 %v557_v9, %v231_v56  ;;  %v268_v2 = vadd.f32 %v557_v9, %v232_v57  ;;  %v293_v5 = vmax.f32 %v261_v58, 0.0  ;;  %v294_v6 = vmax.f32 %v262_v59, 0.0 }
  0x1e   : > { %v295_v7 = vmax.f32 %v263_v60, 0.0  ;;  %v296_v8 = vmax.f32 %v264_v61, 0.0  ;;  %v297_v12 = vmax.f32 %v265_v62, 0.0  ;;  %v298_v13 = vmax.f32 %v266_v63, 0.0 }
  0x1f   : > { %v299_v14 = vmax.f32 %v267_v1, 0.0  ;;  %v300_v15 = vmax.f32 %v268_v2, 0.0  ;;  %326 = vst.msk [vmem:[%s575_s23 + $0x40] sm:$0xff] %vm317_vm0, %v293_v5  ;;  %327 = vst.msk [vmem:[%s575_s23 + $0x48] sm:$0xff] %vm317_vm0, %v294_v6  ;;  %v457_v18 = vunpack.c.l.bf16 %v491_v4  ;;  %v458_v19 = vunpack.c.h.bf16 %v491_v4 }
  0x20   : > { %328 = vst.msk [vmem:[%s575_s23 + $0x50] sm:$0xff] %vm317_vm0, %v295_v7  ;;  %329 = vst.msk [vmem:[%s575_s23 + $0x58] sm:$0xff] %vm317_vm0, %v296_v8  ;;  %v461_v20 = vunpack.c.l.bf16 %v492_v10  ;;  %v462_v21 = vunpack.c.h.bf16 %v492_v10  ;;  %v465_v22 = vunpack.c.l.bf16 %v493_v11  ;;  %v466_v23 = vunpack.c.h.bf16 %v493_v11 }
  0x21   : > { %330 = vst.msk [vmem:[%s575_s23 + $0x60] sm:$0xff] %vm317_vm0, %v297_v12  ;;  %331 = vst.msk [vmem:[%s575_s23 + $0x68] sm:$0xff] %vm317_vm0, %v298_v13  ;;  %v233_v24 = vmul.f32 %v453_v16, %v548_v0  ;;  %v234_v25 = vmul.f32 %v454_v17, %v548_v0  ;;  %v235_v26 = vmul.f32 %v457_v18, %v548_v0  ;;  %v469_v52 = vunpack.c.l.bf16 %v494_v40 }
  0x22   : > { %332 = vst.msk [vmem:[%s575_s23 + $0x70] sm:$0xff] %vm317_vm0, %v299_v14  ;;  %333 = vst.msk [vmem:[%s575_s23 + $0x78] sm:$0xff] %vm317_vm0, %v300_v15  ;;  %v236_v27 = vmul.f32 %v458_v19, %v548_v0  ;;  %v237_v28 = vmul.f32 %v461_v20, %v548_v0  ;;  %v238_v29 = vmul.f32 %v462_v21, %v548_v0  ;;  %v470_v53 = vunpack.c.h.bf16 %v494_v40 }
  0x23   : > { %v239_v30 = vmul.f32 %v465_v22, %v548_v0  ;;  %v240_v31 = vmul.f32 %v466_v23, %v548_v0  ;;  %v269_v32 = vadd.f32 %v557_v9, %v233_v24  ;;  %v270_v33 = vadd.f32 %v557_v9, %v234_v25 }
  0x24   : > { %v271_v34 = vadd.f32 %v557_v9, %v235_v26  ;;  %v272_v35 = vadd.f32 %v557_v9, %v236_v27  ;;  %v273_v36 = vadd.f32 %v557_v9, %v237_v28  ;;  %v274_v37 = vadd.f32 %v557_v9, %v238_v29 }
  0x25   : > { %v275_v38 = vadd.f32 %v557_v9, %v239_v30  ;;  %v276_v39 = vadd.f32 %v557_v9, %v240_v31  ;;  %v301_v42 = vmax.f32 %v269_v32, 0.0  ;;  %v302_v43 = vmax.f32 %v270_v33, 0.0 }
  0x26   : > { %v303_v44 = vmax.f32 %v271_v34, 0.0  ;;  %v304_v45 = vmax.f32 %v272_v35, 0.0  ;;  %v305_v48 = vmax.f32 %v273_v36, 0.0  ;;  %v306_v49 = vmax.f32 %v274_v37, 0.0 }
  0x27   : > { %v307_v50 = vmax.f32 %v275_v38, 0.0  ;;  %v308_v51 = vmax.f32 %v276_v39, 0.0  ;;  %334 = vst.msk [vmem:[%s575_s23 + $0x80] sm:$0xff] %vm317_vm0, %v301_v42  ;;  %335 = vst.msk [vmem:[%s575_s23 + $0x88] sm:$0xff] %vm317_vm0, %v302_v43  ;;  %v473_v54 = vunpack.c.l.bf16 %v495_v41  ;;  %v474_v55 = vunpack.c.h.bf16 %v495_v41 }
  0x28   : > { %336 = vst.msk [vmem:[%s575_s23 + $0x90] sm:$0xff] %vm317_vm0, %v303_v44  ;;  %337 = vst.msk [vmem:[%s575_s23 + $0x98] sm:$0xff] %vm317_vm0, %v304_v45  ;;  %v477_v56 = vunpack.c.l.bf16 %v496_v46  ;;  %v478_v57 = vunpack.c.h.bf16 %v496_v46  ;;  %v481_v58 = vunpack.c.l.bf16 %v497_v47  ;;  %v482_v59 = vunpack.c.h.bf16 %v497_v47 }
  0x29   : > { %338 = vst.msk [vmem:[%s575_s23 + $0xa0] sm:$0xff] %vm317_vm0, %v305_v48  ;;  %339 = vst.msk [vmem:[%s575_s23 + $0xa8] sm:$0xff] %vm317_vm0, %v306_v49  ;;  %v241_v60 = vmul.f32 %v469_v52, %v548_v0  ;;  %v242_v61 = vmul.f32 %v470_v53, %v548_v0  ;;  %v243_v62 = vmul.f32 %v473_v54, %v548_v0 }
  0x2a   : > { %340 = vst.msk [vmem:[%s575_s23 + $0xb0] sm:$0xff] %vm317_vm0, %v307_v50  ;;  %341 = vst.msk [vmem:[%s575_s23 + $0xb8] sm:$0xff] %vm317_vm0, %v308_v51  ;;  %v244_v63 = vmul.f32 %v474_v55, %v548_v0  ;;  %v245_v1 = vmul.f32 %v477_v56, %v548_v0  ;;  %v246_v2 = vmul.f32 %v478_v57, %v548_v0 }
  0x2b   : > { %v247_v3 = vmul.f32 %v481_v58, %v548_v0  ;;  %v248_v4 = vmul.f32 %v482_v59, %v548_v0  ;;  %v277_v5 = vadd.f32 %v557_v9, %v241_v60  ;;  %v278_v6 = vadd.f32 %v557_v9, %v242_v61 }
  0x2c   : > { %v279_v7 = vadd.f32 %v557_v9, %v243_v62  ;;  %v280_v8 = vadd.f32 %v557_v9, %v244_v63  ;;  %v281_v10 = vadd.f32 %v557_v9, %v245_v1  ;;  %v282_v11 = vadd.f32 %v557_v9, %v246_v2 }
  0x2d   : > { %v283_v0 = vadd.f32 %v557_v9, %v247_v3  ;;  %v284_v12 = vadd.f32 %v557_v9, %v248_v4  ;;  %v309_v13 = vmax.f32 %v277_v5, 0.0  ;;  %v310_v14 = vmax.f32 %v278_v6, 0.0 }
  0x2e   : > { %v311_v15 = vmax.f32 %v279_v7, 0.0  ;;  %v312_v16 = vmax.f32 %v280_v8, 0.0  ;;  %v313_v17 = vmax.f32 %v281_v10, 0.0  ;;  %v314_v18 = vmax.f32 %v282_v11, 0.0 }
  0x2f   : > { %v315_v19 = vmax.f32 %v283_v0, 0.0  ;;  %v316_v20 = vmax.f32 %v284_v12, 0.0  ;;  %342 = vst.msk [vmem:[%s575_s23 + $0xc0] sm:$0xff] %vm317_vm0, %v309_v13  ;;  %343 = vst.msk [vmem:[%s575_s23 + $0xc8] sm:$0xff] %vm317_vm0, %v310_v14 }
  0x30   : > { %344 = vst.msk [vmem:[%s575_s23 + $0xd0] sm:$0xff] %vm317_vm0, %v311_v15  ;;  %345 = vst.msk [vmem:[%s575_s23 + $0xd8] sm:$0xff] %vm317_vm0, %v312_v16 }
  0x31   : > { %346 = vst.msk [vmem:[%s575_s23 + $0xe0] sm:$0xff] %vm317_vm0, %v313_v17  ;;  %347 = vst.msk [vmem:[%s575_s23 + $0xe8] sm:$0xff] %vm317_vm0, %v314_v18 }
  0x32   : > { %348 = vst.msk [vmem:[%s575_s23 + $0xf0] sm:$0xff] %vm317_vm0, %v315_v19  ;;  %349 = vst.msk [vmem:[%s575_s23 + $0xf8] sm:$0xff] %vm317_vm0, %v316_v20 }
  0x33 PF: > { %s12_s9 = sadd.s32 1, %s512_s9  }
  0x34   : > { %p9_p4 = scmp.ge.s32.totalorder %s12_s9, 22  }
  0x36   :  { %11 = sbr.rel (!%p9_p4) target bundleno = 1 (0x1), region = 58 }

// kernel: deconv_block_forward.2
= control target key start
LH: loop header
LB: loop body
LE: loop exit
PB: predicated region body
PF: predicated region fallthrough
CT: control target
= control target key end

     0   :  { %s1839_s0 = inlined_call_operand.vmem [shape: s32[20], index: 0, kind: input, shape index: {}]   ;;  %s1840_s2 = inlined_call_operand.vmem [shape: bf16[5120,128], index: 2, kind: input, shape index: {}]   ;;  %s1841_s3 = inlined_call_operand.vmem [shape: bf16[8,128,128], index: 3, kind: input, shape index: {}]   ;;  %s1842_s4 = inlined_call_operand.vmem [shape: bf16[5120,8], index: 4, kind: output, shape index: {0}]   ;;  %s1843_s5 = inlined_call_operand.vmem [shape: f32[20,2,128], index: 5, kind: output, shape index: {1}]   ;;  %s1844_s1 = inlined_call_operand.vmem [shape: s32[20], index: 1, kind: input, shape index: {}]  }
   0x1   :  { %s11_s20 = sshll.u32 %s1839_s0, 4  ;;  %s15_s23 = sshll.u32 %s1844_s1, 4  ;;  %s12_s20 = int_to_ptr.vmem [resolvable:$true] %s11_s20  ;;  %s16_s23 = int_to_ptr.vmem [resolvable:$true] %s15_s23 }
   0x2   :  { %s1367_s24 = scalar_lea.vmem %s12_s20, 16  ;;  %p1372_p1 = scmp.lt.s32.totalorder %s12_s20, %s12_s20 }
   0x3   :  { %p1368_p0 = scmp.ne.s32.totalorder %s12_s20, %s1367_s24  ;;  %p1373_p2 = scmp.lt.s32.totalorder %s1367_s24, %s1367_s24 }
   0x5   :  { %p1374_p3 = por %p1373_p2, %p1372_p1 }
   0x7   :  { %p1375_p4 = pnand %p1374_p3, %p1368_p0 }
   0x9   :  { %1378 = shalt.err (!%p1375_p4)  }
   0xa   :  { %s1401_s25 = smov [#allocation3]   ;;  %s1379_s26 = scalar_lea.vmem %s16_s23, 16 }
   0xb   :  { %14 = dma.vmem_to_smem %s12_s20, 16, %s1401_s25, [#allocation2] }
   0xc   :  { %p1380_p5 = scmp.ne.s32.totalorder %s16_s23, %s1379_s26  ;;  %p1384_p6 = scmp.lt.s32.totalorder %s16_s23, %s16_s23 }
   0xd   :  { %p1385_p7 = scmp.lt.s32.totalorder %s1379_s26, %s1379_s26 }
   0xf   :  { %p1386_p8 = por %p1385_p7, %p1384_p6 }
  0x11   :  { %p1387_p9 = pnand %p1386_p8, %p1380_p5 }
  0x13   :  { %1390 = shalt.err (!%p1387_p9)  }
  0x14   :  { %s1402_s0 = smov [#allocation4]  }
  0x15   :  { %18 = dma.vmem_to_smem %s16_s23, 16, %s1402_s0, [#allocation2] }
  0x16   :  { %1395 = dma.done.wait [#allocation2], 32 }
  0x17   :  { %1396 = vsyncadd [#allocation2], 4294967264 }
  0x18   :  { %20 = sfence }
  0x19   :  { %s1440_s1 = smov 0  }
  0x1a LB: > { %s1446_s27 = sadd.s32 4294967295, %s1399_s1   ;;  %p1113_p10 = scmp.ge.s32.totalorder %s1399_s1, 1  ;;  %s1399_s1 = sphi %s1440_s1, %s26_s1  }
  0x1b   : > { %p167_p11 = scmp.lt.s32.totalorder %s1399_s1, 21 }
  0x1d   : > { %p168_p12 = pnand %p1113_p10, %p167_p11 }
  0x1e   : > { %s207_s28 = sld [smem:[#allocation3 + %s1446_s27]] (!%p168_p12)  ;;  %s1114_s29 = sshll.u32 (!%p168_p12), %s1446_s27, 5 }
  0x1f   : > { %171 = sbr.rel (%p168_p12) target bundleno = 352 (0x160), region = 28  ;;  %p202_p13 = scmp.lt.s32.totalorder (!%p168_p12), %s1114_s29, 639 }
  0x20   : > { %s578_s13 = sld [smem:[#allocation4 + %s1446_s27]] (!%p168_p12)  ;;  %p220_p1 = scmp.lt.s32.totalorder (!%p168_p12), %s1446_s27, 19 }
  0x24   : > { %s1846_s29 = smov (!%p202_p13, %s1114_s29), 639  ;;  %p208_p0 = scmp.lt.s32.totalorder %s207_s28, 7  ;;  %v579_v24 = vlaneseq  ;;  %vm977_vm2 = vcmask 60416   ;;  %v1403_v35 = vmov 0.0  }
  0x25   : > { %s1115_s30 = sshll.u32 %s1846_s29, 2  ;;  %s1850_s27 = smov (!%p220_p1, %s1446_s27), 19 }
  0x26   : > { %s1460_s8 = scalar_lea.vmem %s1840_s2, %s1115_s30  ;;  %s1848_s28 = smov (!%p208_p0, %s207_s28), 7  ;;  %v1492_v25 = vshrl.u32 %v579_v24, 7  ;;  %v1495_v27 = vstv %s578_s13 }
  0x27   : > { %v1351_v0 = vld [vmem:[%s1460_s8] sm:$0xff]   ;;  %s1211_s9 = sshll.u32 %s1848_s28, 6  ;;  %v1352_v10 = vld [vmem:[%s1460_s8 + $0x8] sm:$0xff]   ;;  %v1353_v12 = vld [vmem:[%s1460_s8 + $0x10] sm:$0xff]   ;;  %s1510_s16 = scalar_lea.vmem %s1842_s4, %s1115_s30 }
  0x28   : > { %1284 = vmatprep.mubr.bf16.mxu0 %v1351_v0  ;;  %s1466_s12 = scalar_lea.vmem %s1841_s3, %s1211_s9  ;;  %v1358_v5 = vld [vmem:[%s1460_s8 + $0x40] sm:$0xff]   ;;  %v1360_v11 = vld [vmem:[%s1460_s8 + $0x48] sm:$0xff]   ;;  %v1361_v13 = vld [vmem:[%s1460_s8 + $0x50] sm:$0xff]   ;;  %v582_v26 = vadd.s32 16, %v1492_v25  ;;  %v583_v28 = vadd.s32 24, %v1492_v25  ;;  %vm613_vm0 = vcmp.lt.s32.totalorder %v1492_v25, %v1495_v27  ;;  %v581_v29 = vadd.s32 8, %v1492_v25 }
  0x29   : > { %v1343_v1 = vld [vmem:[%s1466_s12 + $0x38] sm:$0xff]   ;;  %v1344_v2 = vld [vmem:[%s1466_s12 + $0x30] sm:$0xff]   ;;  %v1345_v3 = vld [vmem:[%s1466_s12 + $0x28] sm:$0xff]   ;;  %1300 = vmatprep.mubr.bf16.mxu1 %v1358_v5  ;;  %v586_v30 = vadd.s32 48, %v1492_v25  ;;  %v584_v31 = vadd.s32 32, %v1492_v25  ;;  %v587_v32 = vadd.s32 56, %v1492_v25 }
  0x2a   : > { %1268 = vmatprep.subr.bf16.mxu0 %v1343_v1  ;;  %1316 = vmatprep.subr.bf16.mxu1 %v1343_v1  ;;  %v1346_v4 = vld [vmem:[%s1466_s12 + $0x20] sm:$0xff]   ;;  %v1347_v6 = vld [vmem:[%s1466_s12 + $0x18] sm:$0xff]   ;;  %v1348_v7 = vld [vmem:[%s1466_s12 + $0x10] sm:$0xff]   ;;  %v585_v33 = vadd.s32 40, %v1492_v25  ;;  %vm615_vm1 = vcmp.lt.s32.totalorder %v582_v26, %v1495_v27  ;;  %v1145_v36 = vsel %vm613_vm0, 1.0, %v1403_v35  ;;  %vm616_vm3 = vcmp.lt.s32.totalorder %v583_v28, %v1495_v27  ;;  %s1120_s17 = sshll.u32 %s1850_s27, 1 }
  0x2b   : > { %1269 = vmatpush3.bf16.msra.mxu0 %v1343_v1  ;;  %1324 = vmatpush3.bf16.msra.mxu1 %v1343_v1  ;;  %v1349_v8 = vld [vmem:[%s1466_s12 + $0x8] sm:$0xff]   ;;  %v1350_v9 = vld [vmem:[%s1466_s12] sm:$0xff]   ;;  %v1354_v14 = vld [vmem:[%s1460_s8 + $0x18] sm:$0xff]   ;;  %vm614_vm4 = vcmp.lt.s32.totalorder %v581_v29, %v1495_v27  ;;  %vm619_vm5 = vcmp.lt.s32.totalorder %v586_v30, %v1495_v27  ;;  %vm617_vm6 = vcmp.lt.s32.totalorder %v584_v31, %v1495_v27  ;;  %v590_v41 = vadd.s32 80, %v1492_v25  ;;  %s223_s20 = scalar_lea.vmem %s1843_s5, %s1120_s17 }
  0x2c   : > { %1270 = vmatprep.subr.bf16.mxu0 %v1344_v2  ;;  %1317 = vmatprep.subr.bf16.mxu1 %v1344_v2  ;;  %v1362_v15 = vld [vmem:[%s1460_s8 + $0x58] sm:$0xff]   ;;  %v1355_v16 = vld [vmem:[%s1460_s8 + $0x20] sm:$0xff]   ;;  %v1356_v18 = vld [vmem:[%s1460_s8 + $0x28] sm:$0xff]   ;;  %vm620_vm7 = vcmp.lt.s32.totalorder %v587_v32, %v1495_v27  ;;  %v588_v42 = vadd.s32 64, %v1492_v25  ;;  %v1147_v44 = vsel %vm615_vm1, 1.0, %v1403_v35  ;;  %vm618_vm8 = vcmp.lt.s32.totalorder %v585_v33, %v1495_v27 }
  0x2d   : > { %v1363_v17 = vld [vmem:[%s1460_s8 + $0x60] sm:$0xff]   ;;  %v1364_v19 = vld [vmem:[%s1460_s8 + $0x68] sm:$0xff]   ;;  %v1357_v20 = vld [vmem:[%s1460_s8 + $0x30] sm:$0xff]   ;;  %v591_v46 = vadd.s32 88, %v1492_v25  ;;  %v1148_v49 = vsel %vm616_vm3, 1.0, %v1403_v35  ;;  %v1146_v50 = vsel %vm614_vm4, 1.0, %v1403_v35  ;;  %vm623_vm9 = vcmp.lt.s32.totalorder %v590_v41, %v1495_v27 }
  0x2e   : > { %v1365_v21 = vld [vmem:[%s1460_s8 + $0x70] sm:$0xff]   ;;  %v1359_v22 = vld [vmem:[%s1460_s8 + $0x38] sm:$0xff]   ;;  %v1151_v54 = vsel %vm619_vm5, 1.0, %v1403_v35  ;;  %v1149_v55 = vsel %vm617_vm6, 1.0, %v1403_v35  ;;  %v1561_v56 = vsel %vm620_vm7, 1.0, %v1403_v35  ;;  %v1150_v58 = vsel %vm618_vm8, 1.0, %v1403_v35 }
  0x2f   : > { %1271 = vmatpush3.bf16.msra.mxu0 %v1344_v2  ;;  %1325 = vmatpush3.bf16.msra.mxu1 %v1344_v2  ;;  %v1366_v23 = vld [vmem:[%s1460_s8 + $0x78] sm:$0xff]   ;;  %vm621_vm10 = vcmp.lt.s32.totalorder %v588_v42, %v1495_v27  ;;  %vm624_vm11 = vcmp.lt.s32.totalorder %v591_v46, %v1495_v27  ;;  %v589_v2 = vadd.s32 72, %v1492_v25 }
  0x30   : > { %1272 = vmatprep.subr.bf16.mxu0 %v1345_v3  ;;  %1318 = vmatprep.subr.bf16.mxu1 %v1345_v3 }
  0x31   : > { %vm622_vm12 = vcmp.lt.s32.totalorder %v589_v2, %v1495_v27 }
  0x33   : > { %1273 = vmatpush3.bf16.msra.mxu0 %v1345_v3  ;;  %1326 = vmatpush3.bf16.msra.mxu1 %v1345_v3  ;;  %v594_v3 = vadd.s32 112, %v1492_v25 }
  0x34   : > { %1274 = vmatprep.subr.bf16.mxu0 %v1346_v4  ;;  %1319 = vmatprep.subr.bf16.mxu1 %v1346_v4 }
  0x35   : > { %vm627_vm13 = vcmp.lt.s32.totalorder %v594_v3, %v1495_v27  ;;  %v1668_v3 = vadd.s32 144, %v1492_v25 }
  0x37   : > { %1275 = vmatpush3.bf16.msra.mxu0 %v1346_v4  ;;  %1327 = vmatpush3.bf16.msra.mxu1 %v1346_v4  ;;  %vm631_vm1 = vcmp.lt.s32.totalorder %v1668_v3, %v1495_v27 }
  0x38   : > { %1276 = vmatprep.subr.bf16.mxu0 %v1347_v6  ;;  %1320 = vmatprep.subr.bf16.mxu1 %v1347_v6 }
  0x3b   : > { %1277 = vmatpush3.bf16.msra.mxu0 %v1347_v6  ;;  %1328 = vmatpush3.bf16.msra.mxu1 %v1347_v6 }
  0x3c   : > { %1278 = vmatprep.subr.bf16.mxu0 %v1348_v7  ;;  %1321 = vmatprep.subr.bf16.mxu1 %v1348_v7 }
  0x3f   : > { %1279 = vmatpush3.bf16.msra.mxu0 %v1348_v7  ;;  %1329 = vmatpush3.bf16.msra.mxu1 %v1348_v7 }
  0x40   : > { %1280 = vmatprep.subr.bf16.mxu0 %v1349_v8  ;;  %1322 = vmatprep.subr.bf16.mxu1 %v1349_v8 }
  0x43   : > { %1281 = vmatpush3.bf16.msra.mxu0 %v1349_v8  ;;  %1330 = vmatpush3.bf16.msra.mxu1 %v1349_v8 }
  0x44   : > { %1282 = vmatprep.subr.bf16.mxu0 %v1350_v9  ;;  %1323 = vmatprep.subr.bf16.mxu1 %v1350_v9 }
  0x47   : > { %1283 = vmatpush3.bf16.msra.mxu0 %v1350_v9  ;;  %1331 = vmatpush3.bf16.msra.mxu1 %v1350_v9 }
  0x4a   : > { %1285 = vmatmul.mubr.bf16.vlgmr.msra.gmra.mxu0 %v1352_v10  ;;  %1301 = vmatmul.mubr.bf16.vlgmr.msra.gmra.mxu1 %v1360_v11  ;;  %v1593_v11 = vsel %vm623_vm9, 1.0, %v1403_v35 }
  0x4b   : > { %1288 = vmatprep.mubr.bf16.mxu0 %v1353_v12  ;;  %1304 = vmatprep.mubr.bf16.mxu1 %v1361_v13  ;;  %v1153_v12 = vsel %vm621_vm10, 1.0, %v1403_v35  ;;  %v592_v13 = vadd.s32 96, %v1492_v25 }
  0x4d   : > { %vm625_vm14 = vcmp.lt.s32.totalorder %v592_v13, %v1495_v27 }
  0x52   : > { %1289 = vmatmul.mubr.bf16.gmra.mxu0 %v1354_v14  ;;  %1305 = vmatmul.mubr.bf16.gmra.mxu1 %v1362_v15 }
  0x53   : > { %1292 = vmatprep.mubr.bf16.mxu0 %v1355_v16  ;;  %1308 = vmatprep.mubr.bf16.mxu1 %v1363_v17 }
  0x5a   : > { %1293 = vmatmul.mubr.bf16.gmra.mxu0 %v1356_v18  ;;  %1309 = vmatmul.mubr.bf16.gmra.mxu1 %v1364_v19 }
  0x5b   : > { %1296 = vmatprep.mubr.bf16.mxu0 %v1357_v20  ;;  %1312 = vmatprep.mubr.bf16.mxu1 %v1365_v21 }
  0x62   : > { %1297 = vmatmul.mubr.bf16.gmra.mxu0 %v1359_v22  ;;  %1313 = vmatmul.mubr.bf16.gmra.mxu1 %v1366_v23  ;;  %v1611_v22 = vsel %vm624_vm11, 1.0, %v1403_v35 }
 0x10a   : > { %v1512_v34 = vpop.f32.mrf.mxu0  ;;  %v1517_v37 = vpop.f32.mrf.mxu1 }
 0x10b   : > { %v1214_v38 = vpack.c.bf16 %v1512_v34, %v1512_v34  ;;  %v1230_v39 = vpack.c.bf16 %v1517_v37, %v1517_v37  ;;  %v711_v61 = vmul.f32 %v1512_v34, %v1147_v44  ;;  %v1154_v44 = vsel %vm622_vm12, 1.0, %v1403_v35 }
 0x10c   : > { %v451_v40 = vpop.f32.mrf.mxu0  ;;  %v1529_v43 = vpop.f32.mrf.mxu1 }
 0x10d   : > { %980 = vst.msk [vmem:[%s1510_s16 + $0x8] sm:$0xf] %vm977_vm2, %v1214_v38  ;;  %v1212_v45 = vpack.c.bf16 %v451_v40, %v451_v40  ;;  %996 = vst.msk [vmem:[%s1510_s16 + $0x48] sm:$0xf] %vm977_vm2, %v1230_v39  ;;  %v709_v47 = vmul.f32 %v1145_v36, %v451_v40  ;;  %v1228_v51 = vpack.c.bf16 %v1529_v43, %v1529_v43 }
 0x10e   : > { %v1287_v48 = vpop.f32.mrf.mxu0  ;;  %v1548_v52 = vpop.f32.mrf.mxu1  ;;  %v781_v16 = vmul.f32 %v1512_v34, %v711_v61 }
 0x10f   : > { %978 = vst.msk [vmem:[%s1510_s16] sm:$0xf] %vm977_vm2, %v1212_v45  ;;  %v1215_v53 = vpack.c.bf16 %v1287_v48, %v1287_v48  ;;  %994 = vst.msk [vmem:[%s1510_s16 + $0x40] sm:$0xf] %vm977_vm2, %v1228_v51  ;;  %v1231_v59 = vpack.c.bf16 %v1548_v52, %v1548_v52  ;;  %v779_v0 = vmul.f32 %v709_v47, %v451_v40  ;;  %v1641_v45 = vsel %vm627_vm13, 1.0, %v1403_v35 }
 0x110   : > { %v454_v57 = vpop.f32.mrf.mxu0  ;;  %v1570_v60 = vpop.f32.mrf.mxu1  ;;  %v712_v6 = vmul.f32 %v1287_v48, %v1148_v49 }
 0x111   : > { %981 = vst.msk [vmem:[%s1510_s16 + $0xc] sm:$0xf] %vm977_vm2, %v1215_v53  ;;  %v710_v62 = vmul.f32 %v1146_v50, %v454_v57  ;;  %v1213_v63 = vpack.c.bf16 %v454_v57, %v454_v57  ;;  %997 = vst.msk [vmem:[%s1510_s16 + $0x4c] sm:$0xf] %vm977_vm2, %v1231_v59  ;;  %v1229_v4 = vpack.c.bf16 %v1570_v60, %v1570_v60 }
 0x112   : > { %v1576_v1 = vpop.f32.mrf.mxu0  ;;  %v1584_v5 = vpop.f32.mrf.mxu1  ;;  %v782_v26 = vmul.f32 %v1287_v48, %v712_v6 }
 0x113   : > { %v741_v7 = vadd.f32 %v710_v62, %v709_v47  ;;  %v780_v8 = vmul.f32 %v710_v62, %v454_v57  ;;  %979 = vst.msk [vmem:[%s1510_s16 + $0x4] sm:$0xf] %vm977_vm2, %v1213_v63  ;;  %v1218_v9 = vpack.c.bf16 %v1576_v1, %v1576_v1  ;;  %995 = vst.msk [vmem:[%s1510_s16 + $0x44] sm:$0xf] %vm977_vm2, %v1229_v4  ;;  %v595_v57 = vadd.s32 120, %v1492_v25 }
 0x114   : > { %v467_v10 = vpop.f32.mrf.mxu0  ;;  %v1234_v14 = vpack.c.bf16 %v1584_v5, %v1584_v5  ;;  %v1603_v15 = vpop.f32.mrf.mxu1  ;;  %v715_v30 = vmul.f32 %v1576_v1, %v1151_v54  ;;  %v593_v4 = vadd.s32 104, %v1492_v25 }
 0x115   : > { %v742_v17 = vadd.f32 %v741_v7, %v711_v61  ;;  %v811_v18 = vadd.f32 %v780_v8, %v779_v0  ;;  %984 = vst.msk [vmem:[%s1510_s16 + $0x18] sm:$0xf] %vm977_vm2, %v1218_v9  ;;  %v713_v19 = vmul.f32 %v1149_v55, %v467_v10  ;;  %v1216_v20 = vpack.c.bf16 %v467_v10, %v467_v10 }
 0x116   : > { %v1291_v21 = vpop.f32.mrf.mxu0  ;;  %1000 = vst.msk [vmem:[%s1510_s16 + $0x58] sm:$0xf] %vm977_vm2, %v1234_v14  ;;  %v1232_v23 = vpack.c.bf16 %v1603_v15, %v1603_v15  ;;  %v1618_v24 = vpop.f32.mrf.mxu1  ;;  %v1157_v55 = vsel %vm625_vm14, 1.0, %v1403_v35  ;;  %v785_v59 = vmul.f32 %v1576_v1, %v715_v30  ;;  %vm628_vm15 = vcmp.lt.s32.totalorder %v595_v57, %v1495_v27 }
 0x117   : > { %v812_v28 = vadd.f32 %v811_v18, %v781_v16  ;;  %v743_v29 = vadd.f32 %v742_v17, %v712_v6  ;;  %982 = vst.msk [vmem:[%s1510_s16 + $0x10] sm:$0xf] %vm977_vm2, %v1216_v20  ;;  %v1219_v31 = vpack.c.bf16 %v1291_v21, %v1291_v21  ;;  %v1235_v33 = vpack.c.bf16 %v1618_v24, %v1618_v24 }
 0x118   : > { %v470_v32 = vpop.f32.mrf.mxu0  ;;  %998 = vst.msk [vmem:[%s1510_s16 + $0x50] sm:$0xf] %vm977_vm2, %v1232_v23  ;;  %v1629_v34 = vpop.f32.mrf.mxu1  ;;  %v783_v38 = vmul.f32 %v713_v19, %v467_v10  ;;  %v716_v49 = vmul.f32 %v1291_v21, %v1561_v56  ;;  %v596_v10 = vadd.s32 128, %v1492_v25  ;;  %vm626_vm0 = vcmp.lt.s32.totalorder %v593_v4, %v1495_v27 }
 0x119   : > { %v744_v36 = vadd.f32 %v743_v29, %v713_v19  ;;  %v813_v39 = vadd.f32 %v812_v28, %v782_v26  ;;  %v714_v40 = vmul.f32 %v1150_v58, %v470_v32  ;;  %985 = vst.msk [vmem:[%s1510_s16 + $0x1c] sm:$0xf] %vm977_vm2, %v1219_v31  ;;  %v1217_v41 = vpack.c.bf16 %v470_v32, %v470_v32 }
 0x11a   : > { %v1633_v42 = vpop.f32.mrf.mxu0  ;;  %1001 = vst.msk [vmem:[%s1510_s16 + $0x5c] sm:$0xf] %vm977_vm2, %v1235_v33  ;;  %v1233_v46 = vpack.c.bf16 %v1629_v34, %v1629_v34  ;;  %v1647_v47 = vpop.f32.mrf.mxu1  ;;  %v786_v7 = vmul.f32 %v1291_v21, %v716_v49  ;;  %v1692_v26 = vadd.s32 152, %v1492_v25  ;;  %vm629_vm3 = vcmp.lt.s32.totalorder %v596_v10, %v1495_v27 }
 0x11b   : > { %v814_v48 = vadd.f32 %v813_v39, %v783_v38  ;;  %v745_v50 = vadd.f32 %v744_v36, %v714_v40  ;;  %v784_v51 = vmul.f32 %v714_v40, %v470_v32  ;;  %983 = vst.msk [vmem:[%s1510_s16 + $0x14] sm:$0xf] %vm977_vm2, %v1217_v41  ;;  %v1222_v53 = vpack.c.bf16 %v1633_v42, %v1633_v42 }
 0x11c   : > { %v483_v54 = vpop.f32.mrf.mxu0  ;;  %999 = vst.msk [vmem:[%s1510_s16 + $0x54] sm:$0xf] %vm977_vm2, %v1233_v46  ;;  %v1238_v56 = vpack.c.bf16 %v1647_v47, %v1647_v47  ;;  %v1662_v58 = vpop.f32.mrf.mxu1  ;;  %v1160_v39 = vsel %vm628_vm15, 1.0, %v1403_v35  ;;  %v597_v40 = vadd.s32 136, %v1492_v25  ;;  %vm632_vm5 = vcmp.lt.s32.totalorder %v1692_v26, %v1495_v27 }
 0x11d   : > { %v746_v61 = vadd.f32 %v745_v50, %v715_v30  ;;  %v815_v62 = vadd.f32 %v814_v48, %v784_v51  ;;  %v717_v63 = vmul.f32 %v1153_v12, %v483_v54  ;;  %988 = vst.msk [vmem:[%s1510_s16 + $0x28] sm:$0xf] %vm977_vm2, %v1222_v53  ;;  %v1220_v0 = vpack.c.bf16 %v483_v54, %v483_v54 }
 0x11e   : > { %v1295_v2 = vpop.f32.mrf.mxu0  ;;  %1004 = vst.msk [vmem:[%s1510_s16 + $0x68] sm:$0xf] %vm977_vm2, %v1238_v56  ;;  %v1236_v6 = vpack.c.bf16 %v1662_v58, %v1662_v58  ;;  %v1675_v1 = vpop.f32.mrf.mxu1  ;;  %v719_v12 = vmul.f32 %v1633_v42, %v1593_v11  ;;  %v1158_v53 = vsel %vm626_vm0, 1.0, %v1403_v35  ;;  %vm630_vm4 = vcmp.lt.s32.totalorder %v597_v40, %v1495_v27 }
 0x11f   : > { %v816_v8 = vadd.f32 %v815_v62, %v785_v59  ;;  %v747_v9 = vadd.f32 %v746_v61, %v716_v49  ;;  %986 = vst.msk [vmem:[%s1510_s16 + $0x20] sm:$0xf] %vm977_vm2, %v1220_v0  ;;  %v1223_v13 = vpack.c.bf16 %v1295_v2, %v1295_v2  ;;  %v1239_v16 = vpack.c.bf16 %v1675_v1, %v1675_v1 }
 0x120   : > { %v486_v14 = vpop.f32.mrf.mxu0  ;;  %1002 = vst.msk [vmem:[%s1510_s16 + $0x60] sm:$0xf] %vm977_vm2, %v1236_v6  ;;  %v1687_v17 = vpop.f32.mrf.mxu1  ;;  %v787_v19 = vmul.f32 %v717_v63, %v483_v54  ;;  %v720_v31 = vmul.f32 %v1295_v2, %v1611_v22  ;;  %v789_v22 = vmul.f32 %v1633_v42, %v719_v12 }
 0x121   : > { %v748_v18 = vadd.f32 %v747_v9, %v717_v63  ;;  %v817_v20 = vadd.f32 %v816_v8, %v786_v7  ;;  %v718_v21 = vmul.f32 %v1154_v44, %v486_v14  ;;  %989 = vst.msk [vmem:[%s1510_s16 + $0x2c] sm:$0xf] %vm977_vm2, %v1223_v13  ;;  %v1221_v11 = vpack.c.bf16 %v486_v14, %v486_v14 }
 0x122   : > { %v1298_v23 = vpop.f32.mrf.mxu0  ;;  %1005 = vst.msk [vmem:[%s1510_s16 + $0x6c] sm:$0xf] %vm977_vm2, %v1239_v16  ;;  %v1237_v28 = vpack.c.bf16 %v1687_v17, %v1687_v17  ;;  %v1699_v29 = vpop.f32.mrf.mxu1  ;;  %v600_v9 = vadd.s32 160, %v1492_v25 }
 0x123   : > { %v818_v30 = vadd.f32 %v817_v20, %v787_v19  ;;  %v749_v32 = vadd.f32 %v748_v18, %v718_v21  ;;  %v788_v33 = vmul.f32 %v718_v21, %v486_v14  ;;  %987 = vst.msk [vmem:[%s1510_s16 + $0x24] sm:$0xf] %vm977_vm2, %v1221_v11  ;;  %v1226_v36 = vpack.c.bf16 %v1298_v23, %v1298_v23 }
 0x124   : > { %v499_v38 = vpop.f32.mrf.mxu0  ;;  %1003 = vst.msk [vmem:[%s1510_s16 + $0x64] sm:$0xf] %vm977_vm2, %v1237_v28  ;;  %v1242_v41 = vpack.c.bf16 %v1699_v29, %v1699_v29  ;;  %v1712_v44 = vpop.f32.mrf.mxu1  ;;  %v723_v59 = vmul.f32 %v1298_v23, %v1641_v45  ;;  %v1161_v45 = vsel %vm629_vm3, 1.0, %v1403_v35  ;;  %v1162_v18 = vsel %vm630_vm4, 1.0, %v1403_v35 }
 0x125   : > { %v750_v46 = vadd.f32 %v749_v32, %v719_v12  ;;  %v819_v48 = vadd.f32 %v818_v30, %v788_v33  ;;  %v721_v49 = vmul.f32 %v1157_v55, %v499_v38  ;;  %992 = vst.msk [vmem:[%s1510_s16 + $0x38] sm:$0xf] %vm977_vm2, %v1226_v36  ;;  %v1224_v50 = vpack.c.bf16 %v499_v38, %v499_v38 }
 0x126   : > { %v1299_v51 = vpop.f32.mrf.mxu0  ;;  %1008 = vst.msk [vmem:[%s1510_s16 + $0x78] sm:$0xf] %vm977_vm2, %v1242_v41  ;;  %v1240_v42 = vpack.c.bf16 %v1712_v44, %v1712_v44  ;;  %v1726_v54 = vpop.f32.mrf.mxu1  ;;  %v790_v55 = vmul.f32 %v1295_v2, %v720_v31  ;;  %v601_v19 = vadd.s32 168, %v1492_v25  ;;  %v793_v20 = vmul.f32 %v1298_v23, %v723_v59 }
 0x127   : > { %v820_v57 = vadd.f32 %v819_v48, %v789_v22  ;;  %v751_v56 = vadd.f32 %v750_v46, %v720_v31  ;;  %990 = vst.msk [vmem:[%s1510_s16 + $0x30] sm:$0xf] %vm977_vm2, %v1224_v50  ;;  %v1227_v61 = vpack.c.bf16 %v1299_v51, %v1299_v51  ;;  %v1243_v63 = vpack.c.bf16 %v1726_v54, %v1726_v54 }
 0x128   : > { %v502_v62 = vpop.f32.mrf.mxu0  ;;  %1006 = vst.msk [vmem:[%s1510_s16 + $0x70] sm:$0xf] %vm977_vm2, %v1240_v42  ;;  %v791_v2 = vmul.f32 %v721_v49, %v499_v38  ;;  %v1737_v7 = vpop.f32.mrf.mxu1  ;;  %v724_v13 = vmul.f32 %v1299_v51, %v1160_v39  ;;  %v725_v21 = vmul.f32 %v1161_v45, %v1529_v43  ;;  %v1163_v30 = vsel %vm631_vm1, 1.0, %v1403_v35 }
 0x129   : > { %v752_v0 = vadd.f32 %v751_v56, %v721_v49  ;;  %v821_v4 = vadd.f32 %v820_v57, %v790_v55  ;;  %v722_v6 = vmul.f32 %v1158_v53, %v502_v62  ;;  %993 = vst.msk [vmem:[%s1510_s16 + $0x3c] sm:$0xf] %vm977_vm2, %v1227_v61  ;;  %v1225_v8 = vpack.c.bf16 %v502_v62, %v502_v62 }
 0x12a   : > { %1009 = vst.msk [vmem:[%s1510_s16 + $0x7c] sm:$0xf] %vm977_vm2, %v1243_v63  ;;  %v1241_v10 = vpack.c.bf16 %v1737_v7, %v1737_v7  ;;  %v602_v31 = vadd.s32 176, %v1492_v25  ;;  %vm633_vm6 = vcmp.lt.s32.totalorder %v600_v9, %v1495_v27  ;;  %v794_v32 = vmul.f32 %v1299_v51, %v724_v13 }
 0x12b   : > { %v822_v12 = vadd.f32 %v821_v4, %v791_v2  ;;  %v753_v14 = vadd.f32 %v752_v0, %v722_v6  ;;  %v792_v16 = vmul.f32 %v722_v6, %v502_v62  ;;  %991 = vst.msk [vmem:[%s1510_s16 + $0x34] sm:$0xf] %vm977_vm2, %v1225_v8  ;;  %v726_v38 = vmul.f32 %v1162_v18, %v1570_v60 }
 0x12c   : > { %1007 = vst.msk [vmem:[%s1510_s16 + $0x74] sm:$0xf] %vm977_vm2, %v1241_v10  ;;  %v1164_v23 = vsel %vm632_vm5, 1.0, %v1403_v35  ;;  %v603_v39 = vadd.s32 184, %v1492_v25  ;;  %vm634_vm2 = vcmp.lt.s32.totalorder %v601_v19, %v1495_v27  ;;  %v727_v3 = vmul.f32 %v1517_v37, %v1163_v30 }
 0x12d   : > { %v754_v11 = vadd.f32 %v753_v14, %v723_v59  ;;  %v823_v28 = vadd.f32 %v822_v12, %v792_v16  ;;  %v795_v40 = vmul.f32 %v725_v21, %v1529_v43  ;;  %vm635_vm7 = vcmp.lt.s32.totalorder %v602_v31, %v1495_v27 }
 0x12e   : > { %v1165_v46 = vsel %vm633_vm6, 1.0, %v1403_v35  ;;  %v604_v48 = vadd.s32 192, %v1492_v25  ;;  %v728_v49 = vmul.f32 %v1548_v52, %v1164_v23  ;;  %v796_v50 = vmul.f32 %v726_v38, %v1570_v60 }
 0x12f   : > { %v755_v33 = vadd.f32 %v754_v11, %v724_v13  ;;  %v824_v36 = vadd.f32 %v823_v28, %v793_v20  ;;  %vm636_vm8 = vcmp.lt.s32.totalorder %v603_v39, %v1495_v27  ;;  %v1166_v53 = vsel %vm634_vm2, 1.0, %v1403_v35 }
 0x130   : > { %v605_v43 = vadd.s32 200, %v1492_v25  ;;  %v797_v42 = vmul.f32 %v1517_v37, %v727_v3  ;;  %v729_v56 = vmul.f32 %v1165_v46, %v1603_v15  ;;  %v1167_v59 = vsel %vm635_vm7, 1.0, %v1403_v35 }
 0x131   : > { %v825_v41 = vadd.f32 %v824_v36, %v794_v32  ;;  %v756_v22 = vadd.f32 %v755_v33, %v725_v21  ;;  %v606_v61 = vadd.s32 208, %v1492_v25  ;;  %vm637_vm9 = vcmp.lt.s32.totalorder %v604_v48, %v1495_v27 }
 0x132   : > { %v798_v60 = vmul.f32 %v1548_v52, %v728_v49  ;;  %v730_v0 = vmul.f32 %v1166_v53, %v1629_v34  ;;  %v1168_v2 = vsel %vm636_vm8, 1.0, %v1403_v35  ;;  %v607_v37 = vadd.s32 216, %v1492_v25 }
 0x133   : > { %v757_v26 = vadd.f32 %v756_v22, %v726_v38  ;;  %v826_v51 = vadd.f32 %v825_v41, %v795_v40  ;;  %vm638_vm10 = vcmp.lt.s32.totalorder %v605_v43, %v1495_v27  ;;  %v731_v4 = vmul.f32 %v1584_v5, %v1167_v59 }
 0x134   : > { %v799_v45 = vmul.f32 %v729_v56, %v1603_v15  ;;  %vm639_vm11 = vcmp.lt.s32.totalorder %v606_v61, %v1495_v27  ;;  %v1169_v52 = vsel %vm637_vm9, 1.0, %v1403_v35  ;;  %v608_v9 = vadd.s32 224, %v1492_v25 }
 0x135   : > { %v758_v55 = vadd.f32 %v757_v26, %v727_v3  ;;  %v827_v57 = vadd.f32 %v826_v51, %v796_v50  ;;  %v732_v12 = vmul.f32 %v1618_v24, %v1168_v2  ;;  %v800_v14 = vmul.f32 %v730_v0, %v1629_v34 }
 0x136   : > { %vm640_vm12 = vcmp.lt.s32.totalorder %v607_v37, %v1495_v27  ;;  %v1170_v16 = vsel %vm638_vm10, 1.0, %v1403_v35  ;;  %v609_v18 = vadd.s32 232, %v1492_v25  ;;  %v801_v15 = vmul.f32 %v1584_v5, %v731_v4 }
 0x137   : > { %v828_v62 = vadd.f32 %v827_v57, %v797_v42  ;;  %v759_v63 = vadd.f32 %v758_v55, %v728_v49  ;;  %v733_v21 = vmul.f32 %v1169_v52, %v1662_v58  ;;  %v1171_v11 = vsel %vm639_vm11, 1.0, %v1403_v35 }
 0x138   : > { %v610_v28 = vadd.s32 240, %v1492_v25  ;;  %vm641_vm13 = vcmp.lt.s32.totalorder %v608_v9, %v1495_v27  ;;  %v802_v34 = vmul.f32 %v1618_v24, %v732_v12  ;;  %v734_v32 = vmul.f32 %v1170_v16, %v1687_v17 }
 0x139   : > { %v760_v6 = vadd.f32 %v759_v63, %v729_v56  ;;  %v829_v8 = vadd.f32 %v828_v62, %v798_v60  ;;  %v1172_v33 = vsel %vm640_vm12, 1.0, %v1403_v35  ;;  %v611_v5 = vadd.s32 248, %v1492_v25 }
 0x13a   : > { %vm642_vm14 = vcmp.lt.s32.totalorder %v609_v18, %v1495_v27  ;;  %v735_v36 = vmul.f32 %v1647_v47, %v1171_v11  ;;  %v803_v23 = vmul.f32 %v733_v21, %v1662_v58  ;;  %vm643_vm15 = vcmp.lt.s32.totalorder %v610_v28, %v1495_v27 }
 0x13b   : > { %v830_v10 = vadd.f32 %v829_v8, %v799_v45  ;;  %v761_v13 = vadd.f32 %v760_v6, %v730_v0  ;;  %v1173_v24 = vsel %vm641_vm13, 1.0, %v1403_v35  ;;  %v736_v40 = vmul.f32 %v1675_v1, %v1172_v33 }
 0x13c   : > { %v804_v22 = vmul.f32 %v734_v32, %v1687_v17  ;;  %vm644_vm0 = vcmp.lt.s32.totalorder %v611_v5, %v1495_v27  ;;  %v1174_v25 = vsel %vm642_vm14, 1.0, %v1403_v35  ;;  %v805_v46 = vmul.f32 %v1647_v47, %v735_v36 }
 0x13d   : > { %v762_v19 = vadd.f32 %v761_v13, %v731_v4  ;;  %v831_v20 = vadd.f32 %v830_v10, %v800_v14  ;;  %v737_v58 = vmul.f32 %v1173_v24, %v1712_v44  ;;  %v1175_v26 = vsel %vm643_vm15, 1.0, %v1403_v35 }
 0x13e   : > { %v806_v50 = vmul.f32 %v1675_v1, %v736_v40  ;;  %v738_v43 = vmul.f32 %v1174_v25, %v1737_v7  ;;  %v1176_v17 = vsel %vm644_vm0, 1.0, %v1403_v35  ;;  %v739_v27 = vmul.f32 %v1699_v29, %v1175_v26 }
 0x13f   : > { %v832_v30 = vadd.f32 %v831_v20, %v801_v15  ;;  %v763_v31 = vadd.f32 %v762_v19, %v732_v12  ;;  %v807_v47 = vmul.f32 %v737_v58, %v1712_v44  ;;  %v740_v56 = vmul.f32 %v1726_v54, %v1176_v17 }
 0x140   : > { %v808_v1 = vmul.f32 %v738_v43, %v1737_v7  ;;  %v809_v61 = vmul.f32 %v1699_v29, %v739_v27 }
 0x141   : > { %v764_v38 = vadd.f32 %v763_v31, %v733_v21  ;;  %v833_v39 = vadd.f32 %v832_v30, %v802_v34  ;;  %v810_v63 = vmul.f32 %v1726_v54, %v740_v56 }
 0x143   : > { %v834_v3 = vadd.f32 %v833_v39, %v803_v23  ;;  %v765_v41 = vadd.f32 %v764_v38, %v734_v32 }
 0x145   : > { %v766_v48 = vadd.f32 %v765_v41, %v735_v36  ;;  %v835_v49 = vadd.f32 %v834_v3, %v804_v22 }
 0x147   : > { %v836_v51 = vadd.f32 %v835_v49, %v805_v46  ;;  %v767_v53 = vadd.f32 %v766_v48, %v736_v40 }
 0x149   : > { %v768_v42 = vadd.f32 %v767_v53, %v737_v58  ;;  %v837_v55 = vadd.f32 %v836_v51, %v806_v50 }
 0x14b   : > { %v838_v57 = vadd.f32 %v837_v55, %v807_v47  ;;  %v769_v59 = vadd.f32 %v768_v42, %v738_v43 }
 0x14d   : > { %v770_v60 = vadd.f32 %v769_v59, %v739_v27  ;;  %v839_v62 = vadd.f32 %v838_v57, %v808_v1 }
 0x14f   : > { %v771_v35 = vadd.f32 %v770_v60, %v740_v56  ;;  %v840_v0 = vadd.f32 %v839_v62, %v809_v61 }
 0x151   : > { %v772_v2 = vrot.slane %v771_v35, 4  ;;  %v841_v37 = vadd.f32 %v840_v0, %v810_v63 }
 0x153   : > { %v773_v44 = vadd.f32 %v772_v2, %v771_v35  ;;  %v842_v4 = vrot.slane %v841_v37, 4 }
 0x155   : > { %v774_v6 = vrot.slane %v773_v44, 2  ;;  %v843_v45 = vadd.f32 %v842_v4, %v841_v37 }
 0x157   : > { %v775_v8 = vadd.f32 %v774_v6, %v773_v44  ;;  %v844_v52 = vrot.slane %v843_v45, 2 }
 0x159   : > { %v776_v7 = vrot.slane %v775_v8, 1  ;;  %v845_v9 = vadd.f32 %v844_v52, %v843_v45 }
 0x15b   : > { %v777_v29 = vadd.f32 %v776_v7, %v775_v8  ;;  %v846_v54 = vrot.slane %v845_v9, 1 }
 0x15d   : > { %778 = vst [vmem:[%s223_s20] sm:$0x1] %v777_v29  ;;  %v847_v10 = vadd.f32 %v846_v54, %v845_v9 }
 0x15f   : > { %848 = vst [vmem:[%s223_s20 + $0x1] sm:$0x1] %v847_v10 }
 0x160 PF: > { %s26_s1 = sadd.s32 1, %s1399_s1  }
 0x161   : > { %p23_p2 = scmp.ge.s32.totalorder %s26_s1, 22  }
 0x163   :  { %25 = sbr.rel (!%p23_p2) target bundleno = 26 (0x1a), region = 73 }

</bundles_post_ra>
